<compile_context>
chip_gen: v7x
topology: tpu7x:2x2x1
jax: 0.10.0
libtpu: 0.0.40
codegen_flags: <defaults>
</compile_context>

<pallas_src>
import jax
import jax.numpy as jnp
from jax.experimental import pallas as pl
from jax.experimental.pallas import tpu as pltpu

_MIB = 1024 * 1024


def _round_up(n, m):
    return ((n + m - 1) // m) * m


def _vmem_capacity_bytes():
    try:
        return int(pltpu.get_tpu_info().vmem_capacity_bytes)
    except Exception:
        return 64 * _MIB  # conservative default (v7x per-TensorCore VMEM)


def anet_kernel(x_ref, w_ref, b_ref, o_ref):
    """One batch tile of sigmoid(x @ w.T + b).

    x_ref: (tb, F)    VMEM, pipelined over the batch grid
    w_ref: (1, F)     VMEM, same block every step -> stays resident
    b_ref: (1,)       SMEM scalar
    o_ref: (1, 1, tb) VMEM, lane-dense output block
    """
    # w (1,F) . x (tb,F)^T -> (1, tb): contraction over the feature (lane) dim
    # of both operands (the standard flash-attention q.k^T dimension numbers).
    # This places the per-row results directly along lanes, so the output
    # block is lane-dense instead of a (tb, 1) sublane column.
    z = jax.lax.dot_general(
        w_ref[...], x_ref[...],
        dimension_numbers=(((1,), (1,)), ((), ())),
        preferred_element_type=jnp.float32,
    )
    z = z + b_ref[0]
    o_ref[0] = jax.nn.sigmoid(z).astype(o_ref.dtype)


def _choose_batch_tile(B, F, itemsize, x_budget_bytes, value_budget_bytes=4 * _MIB):
    # VMEM footprint of one x row is lane-padded to a multiple of 128.
    row_vmem = _round_up(F, 128) * itemsize
    tb = x_budget_bytes // row_vmem
    # Keep the in-kernel materialized (tb, F) value modest (vreg/compile-time).
    tb = min(tb, value_budget_bytes // max(1, F * itemsize))
    tb = max(tb, 8)
    if tb >= 128:
        tb = (tb // 128) * 128   # unmasked lane-dense stores / aligned DMA
    else:
        tb = (tb // 8) * 8
    return max(tb, 8)


def anet_forward(x, w, b, *, block_b=None):
    """sigmoid(x @ w.T + b)  -- forward pass of PyTorch ANet.

    x: (B, F) activations
    w: (1, F) weight (nn.Linear(in_feature, 1) layout)
    b: (1,)   bias
    returns (B, 1)
    """
    B, F = x.shape
    assert w.shape == (1, F) and b.shape == (1,)
    w = w.astype(x.dtype)

    cap = _vmem_capacity_bytes()
    if cap >= 96 * _MIB:          # v5e / v6e: 128 MiB physical VMEM
        vmem_limit = 64 * _MIB
        x_budget = 8 * _MIB
    else:                         # v7x: 64 MiB per TensorCore
        vmem_limit = min(40 * _MIB, int(cap * 0.7))
        x_budget = 6 * _MIB

    if block_b is not None:
        tb = max(8, (block_b // 8) * 8)
    else:
        tb = _choose_batch_tile(B, F, x.dtype.itemsize, x_budget)

    # Guarantee >= 2 grid steps for large batches so the "parallel" batch axis
    # can feed both TensorCores on v7x (near-zero effect on v5e/v6e).
    if B >= 256:
        tb = min(tb, _round_up(pl.cdiv(B, 2), 128))
    tb = min(tb, _round_up(B, 8))
    tb = max(tb, 8)

    grid_b = pl.cdiv(B, tb)   # ragged final block handled by Pallas; no pad copy

    # Make sure the double-buffered x tile actually fits the scoped limit.
    need = 2 * tb * _round_up(F, 128) * x.dtype.itemsize + 4 * _MIB
    vmem_limit = min(max(vmem_limit, need), max(cap - 2 * _MIB, 32 * _MIB))
    # TODO(synk): add a feature (K) grid axis with a VMEM accumulator for
    # in_feature so large that even an 8-row batch tile exceeds the VMEM limit.

    out = pl.pallas_call(
        anet_kernel,
        out_shape=jax.ShapeDtypeStruct((grid_b, 1, tb), x.dtype),
        grid=(grid_b,),
        in_specs=[
            # Batch-tiled activations: auto double-buffered over the grid.
            pl.BlockSpec((tb, F), lambda i: (i, 0)),
            # Weight row: same block every step -> VMEM-resident.
            pl.BlockSpec((1, F), lambda i: (0, 0)),
            # Bias scalar on the scalar path.
            pl.BlockSpec(memory_space=pltpu.MemorySpace.SMEM),
        ],
        out_specs=pl.BlockSpec((1, 1, tb), lambda i: (i, 0, 0)),
        compiler_params=pltpu.CompilerParams(
            dimension_semantics=("parallel",),
            vmem_limit_bytes=int(vmem_limit),
        ),
    )(x, w, b)

    # (grid_b, 1, tb) -> flat[:B] -> (B, 1); rows past B are discarded garbage
    # from the ragged final block (no input padding copy was ever made).
    return out.reshape(grid_b * tb)[:B].reshape(B, 1)


if __name__ == "__main__":
    key = jax.random.PRNGKey(0)
    k_x, k_w, k_b, k_x2, k_w2 = jax.random.split(key, 5)

    # Small shape consistent with the module: batch=8, in_feature=32.
    batch, in_feature = 8, 32
    bound = 1.0 / float(in_feature) ** 0.5
    w = jax.random.uniform(k_w, (1, in_feature), jnp.float32, -bound, bound)
    b = jax.random.uniform(k_b, (1,), jnp.float32, -bound, bound)
    x = jax.random.normal(k_x, (batch, in_feature), jnp.float32)

    out = anet_forward(x, w, b)
    jax.block_until_ready(out)
    ref = jax.nn.sigmoid(x @ w.T + b)
    assert out.shape == (batch, 1)
    assert jnp.allclose(out, ref, atol=1e-5, rtol=1e-5)

    # Exercise the multi-step grid and the ragged final block (B % tb != 0,
    # handled without any jnp.pad copy of x).
    batch2, feat2 = 300, 160
    bound2 = 1.0 / float(feat2) ** 0.5
    x2 = jax.random.normal(k_x2, (batch2, feat2), jnp.float32)
    w2 = jax.random.uniform(k_w2, (1, feat2), jnp.float32, -bound2, bound2)
    out2 = anet_forward(x2, w2, b, block_b=128)   # grid=(3,), last block has 44 valid rows
    jax.block_until_ready(out2)
    ref2 = jax.nn.sigmoid(x2 @ w2.T + b)
    assert out2.shape == (batch2, 1)
    assert jnp.allclose(out2, ref2, atol=1e-5, rtol=1e-5)

    print("KERNEL_OK")
</pallas_src>

<mosaic_0001>
module attributes {stable_mosaic.version = 11 : i64} {
  func.func @anet_kernel(%arg0: i32, %arg1: memref<8x32xf32, #tpu.memory_space<vmem>>, %arg2: memref<1x32xf32, #tpu.memory_space<vmem>>, %arg3: memref<1xf32, #tpu.memory_space<smem>>, %arg4: memref<1x1x8xf32, #tpu.memory_space<vmem>>) attributes {dimension_semantics = [#tpu.dimension_semantics<parallel>], iteration_bounds = array<i64: 1>, scalar_prefetch = 0 : i64, scratch_operands = 0 : i64, tpu.core_type = #tpu.core_type<tc>, window_params = [{transform_indices = @transform_0, window_bounds = array<i64: 8, 32>}, {pipeline_mode = #tpu.pipeline_mode<synchronous>, transform_indices = @transform_1, window_bounds = array<i64: 1, 32>}, {transform_indices = @transform_2, window_bounds = array<i64: 1>}, {transform_indices = @transform_3, window_bounds = array<i64: 1, 1, 8>}]} {
    %c0 = arith.constant 0 : index
    %c0_0 = arith.constant 0 : index
    %0 = vector.load %arg2[%c0, %c0_0] : memref<1x32xf32, #tpu.memory_space<vmem>>, vector<1x32xf32>
    %c0_1 = arith.constant 0 : index
    %c0_2 = arith.constant 0 : index
    %1 = vector.load %arg1[%c0_1, %c0_2] : memref<8x32xf32, #tpu.memory_space<vmem>>, vector<8x32xf32>
    %cst = arith.constant dense<0.000000e+00> : vector<1x8xf32>
    %2 = tpu.matmul %0, %1, %cst {dimension_numbers = #tpu.dot_dimension_numbers<[1], [1], [0], [0], [0, 0, 1, 0], [], []>} : vector<1x32xf32>, vector<8x32xf32>, vector<1x8xf32> -> vector<1x8xf32>
    %c0_3 = arith.constant 0 : index
    %3 = memref.load %arg3[%c0_3] : memref<1xf32, #tpu.memory_space<smem>>
    %4 = vector.broadcast %3 : f32 to vector<1x8xf32>
    %5 = arith.addf %2, %4 : vector<1x8xf32>
    %6 = arith.negf %5 : vector<1x8xf32>
    %7 = math.exp %6 : vector<1x8xf32>
    %cst_4 = arith.constant 1.000000e+00 : f32
    %8 = vector.broadcast %cst_4 : f32 to vector<1x8xf32>
    %9 = arith.addf %8, %7 : vector<1x8xf32>
    %10 = arith.divf %8, %9 : vector<1x8xf32>
    %c0_5 = arith.constant 0 : index
    %c0_6 = arith.constant 0 : index
    %c0_7 = arith.constant 0 : index
    %11 = vector.load %arg4[%c0_5, %c0_6, %c0_7] : memref<1x1x8xf32, #tpu.memory_space<vmem>>, vector<1x1x8xf32>
    %12 = vector.shape_cast %11 : vector<1x1x8xf32> to vector<1x8xf32>
    %13 = vector.shape_cast %10 : vector<1x8xf32> to vector<1x1x8xf32>
    tpu.vector_store %arg4[%c0_5, %c0_6, %c0_7], %13 {strides = array<i32>} : memref<1x1x8xf32, #tpu.memory_space<vmem>>, vector<1x1x8xf32>,
    return
  }
  func.func @transform_0(%arg0: i32) -> (i32, i32) {
    %c0_i32 = arith.constant 0 : i32
    %c0_i32_0 = arith.constant 0 : i32
    return %arg0, %c0_i32 : i32, i32
  }
  func.func @transform_1(%arg0: i32) -> (i32, i32) {
    %c0_i32 = arith.constant 0 : i32
    %c0_i32_0 = arith.constant 0 : i32
    %c0_i32_1 = arith.constant 0 : i32
    return %c0_i32, %c0_i32_0 : i32, i32
  }
  func.func @transform_2(%arg0: i32) -> i32 {
    %c0_i32 = arith.constant 0 : i32
    %c0_i32_0 = arith.constant 0 : i32
    return %c0_i32 : i32
  }
  func.func @transform_3(%arg0: i32) -> (i32, i32, i32) {
    %c0_i32 = arith.constant 0 : i32
    %c0_i32_0 = arith.constant 0 : i32
    %c0_i32_1 = arith.constant 0 : i32
    return %arg0, %c0_i32, %c0_i32_0 : i32, i32, i32
  }
}

</mosaic_0001>

<bundles_post_ra>
// kernel: tpu_custom_call.1
= control target key start
LH: loop header
LB: loop body
LE: loop exit
PB: predicated region body
PF: predicated region fallthrough
CT: control target
= control target key end

     0   :  { %9 = vsyncpa [#allocation4], 0  ;;  %s252_s0 = inlined_call_operand.hbm [shape: f32[8,32], index: 0, kind: input, shape index: {}]   ;;  %s253_s1 = inlined_call_operand.vmem [shape: f32[1,32], index: 1, kind: input, shape index: {}]   ;;  %s254_s2 = inlined_call_operand.<no memory space> [shape: f32[1], index: 2, kind: input, shape index: {}]   ;;  %s255_s3 = inlined_call_operand.hbm [shape: f32[1,1,8], index: 3, kind: output, shape index: {}]  }
   0x1   :  { %10 = vsyncpa [#allocation5], 0  ;;  %s198_s12 = smov [#allocation3]   ;;  %s150_s16 = scalar_lea.hbm %s252_s0, 128 }
   0x2   :  { %s17_s13 = sshll.u32 %s198_s12, 4  ;;  %p151_p0 = scmp.ne.s32.totalorder %s252_s0, %s150_s16  ;;  %s18_s13 = int_to_ptr.vmem [resolvable:$true] %s17_s13 }
   0x3   :  { %p154_p1 = scmp.lt.u32.totalorder %s150_s16, %s252_s0 }
   0x5   :  { %p156_p2 = pnand %p154_p1, %p151_p0 }
   0x7   :  { %159 = shalt.err (!%p156_p2)
}
   0x8   :  { %s160_s21 = scalar_lea.vmem %s18_s13, 128  ;;  %p165_p4 = scmp.lt.s32.totalorder %s18_s13, %s18_s13 }
   0x9   :  { %p161_p3 = scmp.ne.s32.totalorder %s18_s13, %s160_s21  ;;  %p166_p5 = scmp.lt.s32.totalorder %s160_s21, %s160_s21 }
   0xb   :  { %p167_p6 = por %p166_p5, %p165_p4 }
   0xd   :  { %p168_p7 = pnand %p167_p6, %p161_p3 }
   0xf   :  { %171 = shalt.err (!%p168_p7)
}
  0x10   :  { %20 = dma.hbm_to_vmem [thread:$0]  %s252_s0, 128, %s18_s13, [#allocation4]  }
  0x11   :  { %194 = dma.done.wait [#allocation4], 128  }
  0x12   :  { %195 = vsyncadd [#allocation4], 4294967168  ;;  %v199_v0 = vmov 0.0   ;;  %vm200_vm0 = vmmov 0   ;;  %vm32_vm1 = vcmask 261120   ;;  %v29_v1 = vld [vmem:[#allocation3] sm:$0xff]  ;;  %v31_v3 = vstv %s254_s2 }
  0x13   :  { %137 = vmatprep.subr.mxu0 %v199_v0  ;;  %139 = vmatprep.mubr.msk.f32.mxu0 %vm200_vm0, %v199_v0  ;;  %v28_v2 = vld [vmem:[%s253_s1] sm:$0x1]  ;;  %s201_s0 = smov [#allocation6]   ;;  %vm115_vm2 = vcmask 57344  }
  0x14   :  { %138 = vmatpush3.xpose.msk.msra.mxu0 %vm32_vm1, %v29_v1  ;;  %s123_s28 = sshll.u32 %s201_s0, 4  ;;  %s124_s28 = int_to_ptr.vmem [resolvable:$true] %s123_s28 }
  0x15   :  { %s172_s1 = scalar_lea.vmem %s124_s28, 16  ;;  %s176_s29 = scalar_lea.vmem %s124_s28, 32 }
  0x16   :  { %p173_p8 = scmp.ne.s32.totalorder %s124_s28, %s172_s1  ;;  %p177_p9 = scmp.lt.s32.totalorder %s124_s28, %s124_s28 }
  0x17   :  { %140 = vmatmul.mubr.msk.f32.vlgmr.msra.gmra.mrb[0].mxu0 %vm32_vm1, %v28_v2  ;;  %p178_p10 = scmp.lt.s32.totalorder %s176_s29, %s172_s1 }
  0x19   :  { %p179_p11 = por %p178_p10, %p177_p9 }
  0x1b   :  { %p180_p12 = pnand %p179_p11, %p173_p8 }
  0xea   :  { %v105_v4 = vpop.f32.mrb[0].mxu0 }
  0xeb   :  { %v106_v5 = vadd.f32 %v105_v4, %v31_v3  ;;  %v141_v6 = vpop.f32.mrb[1].mxu0 }
  0xed   :  { %v134_v7 = vmul.f32 -1.442695, %v106_v5 }
  0xef   :  { %146 = vpow2.f32 %v134_v7 }
  0xf9   :  { %v147_v8 = vpop.eup %146 }
  0xfa   :  { %v112_v9 = vadd.f32 1.0, %v147_v8 }
  0xfc   :  { %148 = vrcp.f32 %v112_v9 }
 0x106   :  { %v149_v10 = vpop.eup %148 }
 0x107   :  { %116 = vst.msk [vmem:[#allocation6] sm:$0x1] %vm115_vm2, %v149_v10 }
 0x108   :  { %183 = shalt.err (!%p180_p12)
}
 0x109   :  { %s184_s4 = scalar_lea.hbm %s255_s3, 16 }
 0x10a   :  { %p185_p13 = scmp.ne.s32.totalorder %s255_s3, %s184_s4  ;;  %p188_p0 = scmp.lt.u32.totalorder %s184_s4, %s255_s3 }
 0x10c   :  { %p190_p1 = pnand %p188_p0, %p185_p13 }
 0x10e   :  { %193 = shalt.err (!%p190_p1)
}
 0x10f   :  { %126 = dma.vmem_to_hbm [thread:$0]  %s124_s28, 16, %s255_s3, [#allocation5]  }
 0x110   :  { %196 = dma.done.wait [#allocation5], 16  }
 0x111   :  { %197 = vsyncadd [#allocation5], 4294967280 }
 0x112   :  { %130 = vsyncpa [#allocation4], 1 }
 0x113   :  { %131 = vsyncpa [#allocation5], 1 }

</bundles_post_ra>
